<compile_context>
chip_gen: v6e
topology: v6e:2x2x1
jax: 0.10.0
libtpu: 0.0.40
codegen_flags: <defaults>
</compile_context>

<pallas_src>
import itertools
import math
from functools import partial

import numpy as np
import jax
import jax.numpy as jnp
from jax.experimental import pallas as pl
from jax.experimental.pallas import tpu as pltpu


def build_tables(bins: int, n_class: int):
    """Replicates the torch __init__ mask / threshold_indices tables.

    Returns:
      mask_flat: (BINS, n_class*KPAD) f32 one-hot class masks, class-major on the
                 lane axis, combinations zero-padded to KPAD lanes.
      mask_ckb : (n_class, n_comb, BINS) f32 torch-layout masks (reference only).
      th_table : (n_class-1, n_comb) int32 threshold-index table.
      n_comb, kpad
    """
    combos = list(itertools.combinations(range(1, bins), n_class - 1))
    n_comb = len(combos)
    assert n_comb == math.comb(bins - 1, n_class - 1)
    kpad = ((n_comb + 127) // 128) * 128

    mask_idx = np.zeros((n_comb, bins), dtype=np.float32)
    for i, ths in enumerate(combos):
        for j, th in enumerate(ths):
            mask_idx[i, th:] = j + 1
    mask_ckb = np.stack([(mask_idx == c).astype(np.float32) for c in range(n_class)], axis=0)

    th_rows = [np.count_nonzero(mask_ckb[0], axis=1).astype(np.int32) - 1]
    for i in range(1, n_class - 1):
        th_rows.append(np.count_nonzero(mask_ckb[i], axis=1).astype(np.int32) + th_rows[-1])
    th_table = np.stack(th_rows, axis=0)                      # (n_class-1, n_comb)

    # kernel layout: bins on sublanes, (class, combination) flattened on lanes.
    mask_bck = np.zeros((bins, n_class, kpad), dtype=np.float32)
    mask_bck[:, :, :n_comb] = np.transpose(mask_ckb, (2, 0, 1))
    mask_flat = mask_bck.reshape(bins, n_class * kpad)
    return mask_flat, mask_ckb, th_table, n_comb, kpad


def _multi_otsu_kernel(n_class, kpad, mask_ref, hw_ref, var_ref):
    # mask_ref: (BINS, n_class*KPAD) f32 one-hot, VMEM-resident across grid steps.
    # hw_ref:   (2, TB, BINS) f32 = [hist ; hist*cls] for this batch tile.
    # var_ref:  (TB, KPAD)    f32 between-class variance per combination (lane-dense).
    mask = mask_ref[...]
    h = hw_ref[0]                                    # (TB, BINS)
    hc = hw_ref[1]                                   # (TB, BINS)  hist*cls, folded in wrapper

    # One exact-f32 MXU contraction over bins per operand.
    num_all = jnp.dot(h, mask, preferred_element_type=jnp.float32,
                      precision=jax.lax.Precision.HIGHEST)      # (TB, n_class*KPAD)
    fc_all = jnp.dot(hc, mask, preferred_element_type=jnp.float32,
                     precision=jax.lax.Precision.HIGHEST)       # (TB, n_class*KPAD)

    num, mean = [], []
    for c in range(n_class):                         # static unroll; lane-tile-aligned slices
        n_c = num_all[:, c * kpad:(c + 1) * kpad]
        f_c = fc_all[:, c * kpad:(c + 1) * kpad]
        num.append(n_c)
        mean.append(f_c / n_c)                       # NaN where a class has zero mass (torch parity)

    tb = var_ref.shape[0]
    var = jnp.zeros((tb, kpad), jnp.float32)
    for i, j in itertools.combinations(range(n_class), 2):
        d = mean[i] - mean[j]
        var = var + num[i] * num[j] * d * d
    var_ref[...] = jnp.where(jnp.isnan(var), jnp.float32(0.0), var)   # unmasked lane-dense store


def multi_otsu_threshold(hists, mask_flat, th_table, cls_val, n_class, tile_b=8):
    """Batched MultiOtsu forward (calc_hist=False path).

    hists: (B, BINS) f32 -- each row is one module forward's input histogram.
    Returns ([thresholds_i of shape (B,) for i in range(n_class-1)], var (B, n_comb)).
    """
    n_comb = th_table.shape[1]
    bins, ck = mask_flat.shape
    kpad = ck // n_class
    b = hists.shape[0]
    b_pad = ((b + tile_b - 1) // tile_b) * tile_b

    # fold cls into hist once on the tiny B x BINS slab; pad batch to the tile size.
    h = jnp.zeros((b_pad, bins), jnp.float32).at[:b].set(hists.astype(jnp.float32))
    hw = jnp.stack([h, h * cls_val[None, :]], axis=0)           # (2, B_pad, BINS)

    var_p = pl.pallas_call(
        partial(_multi_otsu_kernel, n_class, kpad),
        out_shape=jax.ShapeDtypeStruct((b_pad, kpad), jnp.float32),
        grid=(b_pad // tile_b,),
        in_specs=[
            pl.BlockSpec((bins, ck), lambda i: (0, 0)),          # constant index -> stays resident
            pl.BlockSpec((2, tile_b, bins), lambda i: (0, i, 0)),
        ],
        out_specs=pl.BlockSpec((tile_b, kpad), lambda i: (i, 0)),
        compiler_params=pltpu.CompilerParams(dimension_semantics=("parallel",)),
    )(mask_flat, hw)

    var = var_p[:b, :n_comb]                                     # (B, n_comb)
    idx = jnp.argmax(var, axis=-1)                               # first occurrence (torch parity)
    thresholds = [th_table[i, idx] for i in range(n_class - 1)]  # tiny gathers, wrapper side
    return thresholds, var


def reference_one(hist, cls_val, mask_ckb, th_table, n_class, n_comb):
    """NumPy transcription of the torch forward (calc_hist=False) for one histogram."""
    masked_hist_cls = hist * cls_val * mask_ckb                  # (C, K, B)
    masked_hist = hist * mask_ckb
    fc = masked_hist_cls.sum(axis=2)
    num = masked_hist.sum(axis=2)
    with np.errstate(invalid="ignore", divide="ignore"):
        mean = fc / num
    var = np.zeros((n_comb,), np.float32)
    for i, j in itertools.combinations(range(n_class), 2):
        var = var + num[i] * num[j] * (mean[i] - mean[j]) ** 2
    var = np.where(np.isnan(var), np.float32(0.0), var).astype(np.float32)
    idx = int(np.argmax(var))
    return [int(th_table[i, idx]) for i in range(n_class - 1)], var


if __name__ == "__main__":
    MIN_VAL, MAX_VAL, N_CLASS = 0, 16, 3
    BINS = MAX_VAL - MIN_VAL                                     # 16
    BATCH = 16

    mask_flat_np, mask_ckb_np, tbl_np, N_COMB, KPAD = build_tables(BINS, N_CLASS)
    mask_flat = jnp.asarray(mask_flat_np)                        # (16, 384)
    th_table = jnp.asarray(tbl_np)                               # (2, 105)
    cls_val = jnp.arange(MIN_VAL, MAX_VAL, 1, dtype=jnp.float32)

    # calc_hist=False path: the module consumes histograms directly.  Build a batch
    # of deterministic histograms from synthetic images (host-side glue).
    # TODO(synk): the calc_hist=True scatter-add histogram stays in plain JAX glue.
    key = jax.random.PRNGKey(0)
    imgs = jax.random.randint(key, (BATCH, 16, 16), MIN_VAL, MAX_VAL)
    hists = jnp.sum(jax.nn.one_hot(imgs.reshape(BATCH, -1), BINS, dtype=jnp.float32), axis=1)

    thresholds, var = multi_otsu_threshold(hists, mask_flat, th_table, cls_val, N_CLASS)
    var = np.asarray(jax.block_until_ready(var))
    thresholds = [np.asarray(jax.block_until_ready(t)) for t in thresholds]

    hists_np = np.asarray(hists)
    cls_np = np.arange(MIN_VAL, MAX_VAL, dtype=np.float32)
    for bidx in range(BATCH):
        ref_th, ref_var = reference_one(hists_np[bidx], cls_np, mask_ckb_np, tbl_np,
                                        N_CLASS, N_COMB)
        assert np.allclose(var[bidx], ref_var, rtol=1e-4, atol=1e-3), \
            f"variance mismatch vs reference at batch element {bidx}"
        assert all(int(thresholds[i][bidx]) == ref_th[i] for i in range(N_CLASS - 1)), \
            f"threshold mismatch vs reference at batch element {bidx}"

    print("KERNEL_OK")
</pallas_src>

<mosaic_0001>
module attributes {stable_mosaic.version = 11 : i64} {
  func.func @_multi_otsu_kernel(%arg0: i32, %arg1: memref<16x384xf32, #tpu.memory_space<vmem>>, %arg2: memref<2x8x16xf32, #tpu.memory_space<vmem>>, %arg3: memref<8x128xf32, #tpu.memory_space<vmem>>) attributes {dimension_semantics = [#tpu.dimension_semantics<parallel>], iteration_bounds = array<i64: 2>, scalar_prefetch = 0 : i64, scratch_operands = 0 : i64, tpu.core_type = #tpu.core_type<tc>, window_params = [{pipeline_mode = #tpu.pipeline_mode<synchronous>, transform_indices = @transform_0, window_bounds = array<i64: 16, 384>}, {transform_indices = @transform_1, window_bounds = array<i64: 2, 8, 16>}, {transform_indices = @transform_2, window_bounds = array<i64: 8, 128>}]} {
    %c0 = arith.constant 0 : index
    %c0_0 = arith.constant 0 : index
    %0 = vector.load %arg1[%c0, %c0_0] : memref<16x384xf32, #tpu.memory_space<vmem>>, vector<16x384xf32>
    %c0_1 = arith.constant 0 : index
    %c0_2 = arith.constant 0 : index
    %c0_3 = arith.constant 0 : index
    %1 = vector.load %arg2[%c0_1, %c0_2, %c0_3] : memref<2x8x16xf32, #tpu.memory_space<vmem>>, vector<1x8x16xf32>
    %2 = vector.shape_cast %1 : vector<1x8x16xf32> to vector<8x16xf32>
    %c1 = arith.constant 1 : index
    %c0_4 = arith.constant 0 : index
    %c0_5 = arith.constant 0 : index
    %3 = vector.load %arg2[%c1, %c0_4, %c0_5] : memref<2x8x16xf32, #tpu.memory_space<vmem>>, vector<1x8x16xf32>
    %4 = vector.shape_cast %3 : vector<1x8x16xf32> to vector<8x16xf32>
    %cst = arith.constant dense<0.000000e+00> : vector<8x384xf32>
    %5 = tpu.matmul %2, %0, %cst {dimension_numbers = #tpu.dot_dimension_numbers<[1], [0], [0], [1], [0, 0, 1, 1], [], []>, precision = #tpu.contract_precision<fp32>} : vector<8x16xf32>, vector<16x384xf32>, vector<8x384xf32> -> vector<8x384xf32>
    %cst_6 = arith.constant dense<0.000000e+00> : vector<8x384xf32>
    %6 = tpu.matmul %4, %0, %cst_6 {dimension_numbers = #tpu.dot_dimension_numbers<[1], [0], [0], [1], [0, 0, 1, 1], [], []>, precision = #tpu.contract_precision<fp32>} : vector<8x16xf32>, vector<16x384xf32>, vector<8x384xf32> -> vector<8x384xf32>
    %7 = vector.extract_strided_slice %5 {offsets = [0, 0], sizes = [8, 128], strides = [1, 1]} : vector<8x384xf32> to vector<8x128xf32>
    %8 = vector.extract_strided_slice %6 {offsets = [0, 0], sizes = [8, 128], strides = [1, 1]} : vector<8x384xf32> to vector<8x128xf32>
    %9 = arith.divf %8, %7 : vector<8x128xf32>
    %10 = vector.extract_strided_slice %5 {offsets = [0, 128], sizes = [8, 128], strides = [1, 1]} : vector<8x384xf32> to vector<8x128xf32>
    %11 = vector.extract_strided_slice %6 {offsets = [0, 128], sizes = [8, 128], strides = [1, 1]} : vector<8x384xf32> to vector<8x128xf32>
    %12 = arith.divf %11, %10 : vector<8x128xf32>
    %13 = vector.extract_strided_slice %5 {offsets = [0, 256], sizes = [8, 128], strides = [1, 1]} : vector<8x384xf32> to vector<8x128xf32>
    %14 = vector.extract_strided_slice %6 {offsets = [0, 256], sizes = [8, 128], strides = [1, 1]} : vector<8x384xf32> to vector<8x128xf32>
    %15 = arith.divf %14, %13 : vector<8x128xf32>
    %cst_7 = arith.constant 0.000000e+00 : f32
    %16 = vector.broadcast %cst_7 : f32 to vector<8x128xf32>
    %17 = arith.subf %9, %12 : vector<8x128xf32>
    %18 = arith.mulf %7, %10 : vector<8x128xf32>
    %19 = arith.mulf %18, %17 : vector<8x128xf32>
    %20 = arith.mulf %19, %17 : vector<8x128xf32>
    %21 = arith.addf %16, %20 : vector<8x128xf32>
    %22 = arith.subf %9, %15 : vector<8x128xf32>
    %23 = arith.mulf %7, %13 : vector<8x128xf32>
    %24 = arith.mulf %23, %22 : vector<8x128xf32>
    %25 = arith.mulf %24, %22 : vector<8x128xf32>
    %26 = arith.addf %21, %25 : vector<8x128xf32>
    %27 = arith.subf %12, %15 : vector<8x128xf32>
    %28 = arith.mulf %10, %13 : vector<8x128xf32>
    %29 = arith.mulf %28, %27 : vector<8x128xf32>
    %30 = arith.mulf %29, %27 : vector<8x128xf32>
    %31 = arith.addf %26, %30 : vector<8x128xf32>
    %32 = arith.cmpf one, %31, %31 : vector<8x128xf32>
    %cst_8 = arith.constant 0.000000e+00 : f32
    %33 = vector.broadcast %cst_8 : f32 to vector<8x128xf32>
    %34 = arith.select %32, %33, %31 : vector<8x128xi1>, vector<8x128xf32>
    %c0_9 = arith.constant 0 : index
    %c0_10 = arith.constant 0 : index
    %35 = vector.load %arg3[%c0_9, %c0_10] : memref<8x128xf32, #tpu.memory_space<vmem>>, vector<8x128xf32>
    tpu.vector_store %arg3[%c0_9, %c0_10], %34 {strides = array<i32>} : memref<8x128xf32, #tpu.memory_space<vmem>>, vector<8x128xf32>,
    return
  }
  func.func @transform_0(%arg0: i32) -> (i32, i32) {
    %c0_i32 = arith.constant 0 : i32
    %c0_i32_0 = arith.constant 0 : i32
    %c0_i32_1 = arith.constant 0 : i32
    return %c0_i32, %c0_i32_0 : i32, i32
  }
  func.func @transform_1(%arg0: i32) -> (i32, i32, i32) {
    %c0_i32 = arith.constant 0 : i32
    %c0_i32_0 = arith.constant 0 : i32
    %c0_i32_1 = arith.constant 0 : i32
    return %c0_i32, %arg0, %c0_i32_0 : i32, i32, i32
  }
  func.func @transform_2(%arg0: i32) -> (i32, i32) {
    %c0_i32 = arith.constant 0 : i32
    %c0_i32_0 = arith.constant 0 : i32
    return %arg0, %c0_i32 : i32, i32
  }
}

</mosaic_0001>

<bundles_post_ra>
// kernel: tpu_custom_call.1
= control target key start
LH: loop header
LB: loop body
LE: loop exit
PB: predicated region body
PF: predicated region fallthrough
CT: control target
= control target key end

     0   :  { %7 = vsyncpa [#allocation3], 0  ;;  %s2992_s0 = inlined_call_operand.hbm [shape: f32[16,384], index: 0, kind: input, shape index: {}]   ;;  %s2993_s1 = inlined_call_operand.hbm [shape: f32[2,16,16], index: 1, kind: input, shape index: {}]   ;;  %s2994_s2 = inlined_call_operand.hbm [shape: f32[16,128], index: 2, kind: output, shape index: {}]  }
   0x1   :  { %8 = vsyncpa [#allocation6], 0 }
   0x2   :  { %10 = vsyncpa [#allocation6 + $0x1], 0 }
   0x3   :  { %11 = vsyncpa [#allocation4], 0 }
   0x4   :  { %13 = vsyncpa [#allocation4 + $0x1], 0  ;;  %s2566_s9 = smov 0   ;;  %s2568_s10 = smov 0  }
   0x5   :  { %s2570_s11 = smov 0   ;;  %s2572_s12 = smov 0  }
   0x6 LB: > { %s2587_s13 = sadd.s32 4294967295, %s2539_s12   ;;  %s2212_s14 = sadd.s32 4294967294, %s2539_s12   ;;  %s2539_s12 = sphi %s2572_s12, %s3016_s12   ;;  %s2535_s11 = sphi %s2570_s11, %s3015_s11   ;;  %s2531_s10 = sphi %s2568_s10, %s3014_s10   ;;  %s2527_s9 = sphi %s2566_s9, %s3013_s9  }
   0x7   : > { %s2591_s15 = sadd.s32 1, %s2539_s12   ;;  %s47_s16 = sadd.s32 1, %s2535_s11 }
   0x8   : > { %s44_s17 = ssub.s32 %s2539_s12, %s2591_s15  ;;  %p54_p0 = scmp.ne.s32.totalorder %s2535_s11, %s2531_s10 }
   0x9   : > { %p45_p1 = scmp.eq.s32.totalorder %s44_s17, 0  ;;  %p55_p2 = scmp.eq.s32.totalorder %s2539_s12, 0 }
   0xa   : > { %p60_p3 = scmp.ne.s32.totalorder %s2531_s10, %s2527_s9  ;;  %p2998_p4 = scmp.eq.s32.totalorder %s2587_s13, 0 }
   0xb   : > { %s2603_s18 = scalar_select %p45_p1, %s2535_s11, %s47_s16  }
   0xc   : > { %p2605_p5 = por %p55_p2, %p54_p0  ;;  %p2611_p6 = por %p2998_p4, %p60_p3 }
   0xd   : > { %p84_p7 = scmp.eq.s32.totalorder %s2587_s13, 1  ;;  %p90_p8 = scmp.eq.s32.totalorder %s2212_s14, 1 }
   0xe   : > { %s3000_s20 = scalar_select %p2611_p6, 1, 0 }
   0xf   : > { %p2213_p9 = scmp.ge.s32.totalorder %s2539_s12, 1  ;;  %p97_p10 = scmp.lt.s32.totalorder %s2539_s12, 3 }
  0x10   : > { %p2618_p11 = por %p84_p7, %p54_p0  ;;  %p2622_p12 = por %p90_p8, %p60_p3 }
  0x11   : > { %p2626_p13 = pnand %p2213_p9, %p97_p10  ;;  %s2541_s24 = smov [#allocation2]  }
  0x12   : > { %s3001_s21 = scalar_select %p2618_p11, 1, 0 }
  0x13   : > { %s3002_s22 = scalar_select %p2622_p12, 1, 0 }
  0x14   : > { %s3003_s23 = scalar_select %p2626_p13, 1, 0 }
  0x15   : > { %p2355_p1 = pneg %p2626_p13  ;;  %s109_s25 = sshll.u32 %s2541_s24, 4  ;;  %s110_s25 = int_to_ptr.vmem [resolvable:$true] %s109_s25 }
  0x16   : > { %p2368_p3 = scmp.lt.s32.totalorder %s2539_s12, 2  ;;  %s123_s27 = sand.u32 1, %s2535_s11  }
  0x17   : > { %p2634_p2 = pnand %p2355_p1, %p2998_p4  ;;  %s2428_s28 = scalar_lea.vmem %s110_s25, 768 }
  0x18   : > { %p2429_p8 = scmp.ne.s32.totalorder %s110_s25, %s2428_s28  ;;  %p2436_p12 = scmp.lt.s32.totalorder %s110_s25, %s110_s25 }
  0x19   : > { %p2419_p7 = pneg %p2634_p2  ;;  %p2437_p11 = scmp.lt.s32.totalorder %s2428_s28, %s2428_s28 }
  0x1b   : > { %p2431_p9 = pnand %p2429_p8, %p2419_p7  ;;  %p2438_p6 = por %p2437_p11, %p2436_p12 }
  0x1d   : > { %p2432_p10 = pneg %p2431_p9 }
  0x1f   : > { %p2439_p13 = pnand %p2438_p6, %p2432_p10 }
  0x21   : > { %2442 = shalt.err (!%p2439_p13)
}
  0x22   : > { %s2542_s29 = smov 384   ;;  %s2543_s30 = smov 24  }
  0x23   : > { %2358 = dma.hbm_to_vmem [thread:$0]  (!%p2634_p2), %s2992_s0, 768, %s110_s25, [#allocation3], %s2542_s29, %s2542_s29, %s2543_s30  }
  0x24   : > { %p2652_p1 = pnand %p2368_p3, %p2605_p5  ;;  %s2216_s6 = sshll.u32 %s123_s27, 4 }
  0x25   : > { %s2217_s7 = sshll.u32 %s2539_s12, 7  ;;  %s127_s17 = scalar_lea.vmem [#allocation5], %s2216_s6 }
  0x26   : > { %s2660_s16 = scalar_lea.hbm %s2993_s1, %s2217_s7  ;;  %s133_s24 = sshll.u32 %s127_s17, 4  ;;  %s2662_s24 = int_to_ptr.vmem [resolvable:$true] %s133_s24 }
  0x27   : > { %s2664_s19 = scalar_lea.sflag [#allocation6], %s123_s27  ;;  %s2443_s25 = scalar_lea.hbm %s2660_s16, 256 }
  0x28   : > { %p2444_p5 = scmp.ne.s32.totalorder %s2660_s16, %s2443_s25  ;;  %p2445_p6 = pneg %p2652_p1 }
  0x29   : > { %s2448_s29 = scalar_lea.hbm %s2993_s1, 512  ;;  %p2449_p13 = scmp.lt.s32.totalorder %s2660_s16, %s2993_s1 }
  0x2a   : > { %p2446_p11 = pnand %p2445_p6, %p2444_p5  ;;  %p2450_p2 = scmp.lt.s32.totalorder %s2448_s29, %s2443_s25 }
  0x2c   : > { %p2447_p12 = pneg %p2446_p11  ;;  %p2451_p3 = por %p2450_p2, %p2449_p13 }
  0x2e   : > { %p2452_p7 = pnand %p2451_p3, %p2447_p12 }
  0x30   : > { %2455 = shalt.err (!%p2452_p7)
}
  0x31   : > { %s2456_s27 = scalar_lea.vmem %s2662_s24, 256  ;;  %s2544_s4 = smov [#allocation5]  }
  0x32   : > { %p2457_p8 = scmp.ne.s32.totalorder %s2662_s24, %s2456_s27  ;;  %s2461_s6 = sshll.u32 %s2544_s4, 4  ;;  %s2462_s6 = int_to_ptr.vmem [resolvable:$false] %s2461_s6 }
  0x33   : > { %s2463_s7 = scalar_lea.vmem %s2462_s6, 512  ;;  %p2464_p5 = scmp.lt.s32.totalorder %s2662_s24, %s2462_s6 }
  0x34   : > { %p2459_p9 = pnand %p2457_p8, %p2445_p6  ;;  %p2465_p11 = scmp.lt.s32.totalorder %s2463_s7, %s2456_s27 }
  0x36   : > { %p2460_p10 = pneg %p2459_p9  ;;  %p2466_p0 = por %p2465_p11, %p2464_p5 }
  0x38   : > { %p2467_p4 = pnand %p2466_p0, %p2460_p10 }
  0x3a   : > { %2470 = shalt.err (!%p2467_p4)
}
  0x3b   : > { %s2545_s8 = smov 256   ;;  %s2546_s14 = smov 128  }
  0x3c   : > { %s2547_s17 = smov 8   ;;  %p3006_p6 = scmp.ne.s32.totalorder %s3003_s23, 0 }
  0x3d   : > { %2362 = dma.hbm_to_vmem [thread:$0]  (!%p2652_p1), %s2660_s16, 256, %s2662_s24, %s2664_s19, %s2545_s8, %s2546_s14, %s2547_s17  }
  0x3e   : > { %145 = sbr.rel (%p3006_p6) target bundleno = 375 (0x177), region = 28  ;;  %p3007_p12 = scmp.eq.s32.totalorder (!%p3006_p6), %s2587_s13, 0 }
  0x43   : > { %2514 = dma.done.wait (%p3007_p12), [#allocation3], 768   ;;  %p3008_p13 = pmov %p3007_p12 }
  0x44   : > { %s2692_s25 = sand.u32 1, %s2531_s10   ;;  %p3009_p4 = scmp.ne.s32.totalorder %s3000_s20, 0 }
  0x45   : > { %2516 = vsyncadd (%p3008_p13), [#allocation3], 4294966528  ;;  %s2220_s26 = sshll.u32 %s2692_s25, 4  ;;  %s152_s28 = scalar_lea.sflag [#allocation6], %s2692_s25 }
  0x46   : > { %s2696_s29 = scalar_lea.vmem [#allocation5], %s2220_s26 }
  0x47   : > { %2518 = dma.done.wait (%p3009_p4), %s152_s28, 256  }
  0x48   : > { %2520 = vsyncadd (%p3009_p4), %s152_s28, 4294967040  ;;  %v2548_v0 = vmov 0.0   ;;  %vm185_vm0 = vcmask 130048   ;;  %v180_v1 = vld [vmem:[#allocation2 + $0x20] sm:$0xff]  ;;  %v179_v2 = vld [vmem:[#allocation2 + $0x18] sm:$0xff]  ;;  %vm2549_vm1 = vmmov 0  }
  0x49   : > { %257 = vmatprep.mubr.f32.mxu0 %v2548_v0  ;;  %353 = vmatprep.mubr.f32.mxu1 %v2548_v0  ;;  %v177_v3 = vld [vmem:[#allocation2 + $0x8] sm:$0xff]  ;;  %v2704_v4 = vand.u32 4294901760, %v180_v1  ;;  %v2706_v5 = vand.u32 4294901760, %v179_v2  ;;  %v176_v7 = vld [vmem:[#allocation2] sm:$0xff]  ;;  %v178_v30 = vld [vmem:[#allocation2 + $0x10] sm:$0xff]  ;;  %s2221_s20 = sshll.u32 %s2692_s25, 3 }
  0x4a   : > { %v2708_v6 = vand.u32 4294901760, %v177_v3  ;;  %v182_v8 = vld [vmem:[%s2696_s29] sm:$0xff]  ;;  %v2711_v9 = vand.u32 4294901760, %v176_v7  ;;  %v181_v24 = vld [vmem:[#allocation2 + $0x28] sm:$0xff]  ;;  %v2773_v35 = vand.u32 4294901760, %v178_v30  ;;  %s2224_s23 = sshll.u32 %s2587_s13, 7 }
  0x4b   : > { %v187_v10 = vsel %vm185_vm0, %v182_v8, 0  ;;  %218 = vmatprep.subr.mxu0 %v2704_v4  ;;  %v2716_v11 = vsub.f32 %v180_v1, %v2704_v4  ;;  %v2721_v13 = vsub.f32 %v179_v2, %v2706_v5  ;;  %v2769_v33 = vand.u32 4294901760, %v181_v24  ;;  %v2222_v40 = vld [vmem:[%s2696_s29 + $0x8] sm:$0xff]  ;;  %s175_s5 = scalar_lea.vmem [#allocation7], %s2221_s20  ;;  %s2955_s30 = scalar_lea.hbm %s2994_s2, %s2224_s23 }
  0x4c   : > { %v2718_v12 = vand.u32 4294901760, %v187_v10  ;;  %220 = vmatpush1.msra.mxu0 %v2706_v5  ;;  %v2725_v14 = vsub.f32 %v177_v3, %v2708_v6  ;;  %v2728_v15 = vsub.f32 %v176_v7, %v2711_v9  ;;  %v2786_v37 = vsub.f32 %v178_v30, %v2773_v35  ;;  %s2130_s16 = sshll.u32 %s175_s5, 4  ;;  %s2117_s3 = scalar_lea.sflag [#allocation4], %s2692_s25  ;;  %s2131_s16 = int_to_ptr.vmem [resolvable:$true] %s2130_s16 }
  0x4d   : > { %222 = vmatprep.subr.mxu0 %v2708_v6  ;;  %v2732_v16 = vand.u32 4294901760, %v2716_v11  ;;  %v2738_v18 = vand.u32 4294901760, %v2721_v13  ;;  %v2779_v36 = vsub.f32 %v181_v24, %v2769_v33  ;;  %v1140_v42 = vsel %vm185_vm0, %v2222_v40, 0  ;;  %s2471_s27 = scalar_lea.vmem %s2131_s16, 128  ;;  %p3010_p1 = scmp.ne.s32.totalorder %s3001_s21, 0 }
  0x4e   : > { %v2735_v17 = vsub.f32 %v187_v10, %v2718_v12  ;;  %224 = vmatpush1.msra.mxu0 %v2711_v9  ;;  %v2742_v19 = vand.u32 4294901760, %v2725_v14  ;;  %v2745_v20 = vand.u32 4294901760, %v2728_v15  ;;  %v2800_v39 = vand.u32 4294901760, %v2786_v37  ;;  %p2472_p0 = scmp.ne.s32.totalorder %s2131_s16, %s2471_s27  ;;  %s2550_s4 = smov [#allocation7]  }
  0x4f   : > { %v300_v21 = vsub.f32 %v2716_v11, %v2732_v16  ;;  %v306_v23 = vsub.f32 %v2721_v13, %v2738_v18  ;;  %391 = vmatprep.subr.mxu0 %v2716_v11  ;;  %v2793_v38 = vand.u32 4294901760, %v2779_v36  ;;  %v2822_v45 = vand.u32 4294901760, %v1140_v42  ;;  %s2475_s13 = sshll.u32 %s2550_s4, 4  ;;  %s2476_s13 = int_to_ptr.vmem [resolvable:$false] %s2475_s13 }
  0x50   : > { %v2750_v22 = vand.u32 4294901760, %v2735_v17  ;;  %v312_v25 = vsub.f32 %v2725_v14, %v2742_v19  ;;  %v318_v26 = vsub.f32 %v2728_v15, %v2745_v20  ;;  %v796_v43 = vsub.f32 %v2786_v37, %v2800_v39  ;;  %p2473_p2 = pnand %p2472_p0, %p3010_p1  ;;  %s2477_s6 = scalar_lea.vmem %s2476_s13, 256 }
  0x51   : > { %v2759_v27 = vand.u32 4294901760, %v300_v21  ;;  %v2763_v29 = vand.u32 4294901760, %v306_v23  ;;  %v789_v41 = vsub.f32 %v2779_v36, %v2793_v38  ;;  %v2837_v47 = vsub.f32 %v1140_v42, %v2822_v45  ;;  %p2478_p7 = scmp.lt.s32.totalorder %s2131_s16, %s2476_s13  ;;  %p2479_p8 = scmp.lt.s32.totalorder %s2477_s6, %s2471_s27 }
  0x52   : > { %v261_v28 = vsub.f32 %v2735_v17, %v2750_v22  ;;  %v2765_v31 = vand.u32 4294901760, %v312_v25  ;;  %v2767_v32 = vand.u32 4294901760, %v318_v26  ;;  %v2829_v46 = vand.u32 4294901760, %v796_v43  ;;  %p2474_p3 = pneg %p2473_p2 }
  0x53   : > { %302 = vmatprep.subr.mxu1 %v2759_v27  ;;  %v2820_v44 = vand.u32 4294901760, %v789_v41  ;;  %v2850_v48 = vand.u32 4294901760, %v2837_v47  ;;  %p2480_p9 = por %p2479_p8, %p2478_p7 }
  0x54   : > { %v262_v34 = vand.u32 4294901760, %v261_v28  ;;  %308 = vmatpush1.msra.mxu1 %v2763_v29 }
  0x55   : > { %314 = vmatprep.subr.mxu1 %v2765_v31  ;;  %v1214_v49 = vsub.f32 %v2837_v47, %v2850_v48  ;;  %p2481_p10 = pnand %p2480_p9, %p2474_p3 }
  0x56   : > { %263 = vmatmul.mubr.f32.vlgmr.msra.gmra.mxu0 %v262_v34  ;;  %320 = vmatpush1.msra.mxu1 %v2767_v32 }
  0x57   : > { %394 = vmatpush1.msra.mxu0 %v2721_v13  ;;  %355 = vmatmul.mubr.f32.vlgmr.msra.gmra.mxu1 %v2718_v12  ;;  %v1215_v50 = vand.u32 4294901760, %v1214_v49 }
  0x58   : > { %397 = vmatprep.subr.mxu0 %v2725_v14  ;;  %433 = vmatprep.mubr.f32.mxu0 %v2548_v0 }
  0x59   : > { %400 = vmatpush1.msra.mxu0 %v2728_v15  ;;  %471 = vmatprep.subr.mxu1 %v2704_v4 }
  0x5a   : > { %436 = vmatmul.mubr.f32.vlgmr.msra.gmra.mxu0 %v2735_v17  ;;  %473 = vmatpush1.msra.mxu1 %v2706_v5 }
  0x5b   : > { %551 = vmatprep.subr.mxu0 %v2732_v16  ;;  %475 = vmatprep.subr.mxu1 %v2708_v6 }
  0x5c   : > { %555 = vmatpush1.msra.mxu0 %v2738_v18  ;;  %477 = vmatpush1.msra.mxu1 %v2711_v9 }
  0x5d   : > { %510 = vmatprep.mubr.f32.mxu1 %v2548_v0  ;;  %559 = vmatprep.subr.mxu0 %v2742_v19 }
  0x5e   : > { %514 = vmatmul.mubr.f32.vlgmr.msra.gmra.mxu1 %v2750_v22  ;;  %563 = vmatpush1.msra.mxu0 %v2745_v20 }
  0x5f   : > { %596 = vmatprep.mubr.f32.mxu0 %v2548_v0  ;;  %633 = vmatprep.subr.mxu1 %v2704_v4 }
  0x60   : > { %598 = vmatmul.mubr.f32.vlgmr.msra.gmra.mxu0 %v2718_v12  ;;  %635 = vmatpush1.msra.mxu1 %v2706_v5 }
  0x61   : > { %2263 = vmatprep.subr.mxu0 %v2548_v0  ;;  %637 = vmatprep.subr.mxu1 %v2708_v6 }
  0x62   : > { %2264 = vmatpush3.msra.mxu0 %v2769_v33  ;;  %639 = vmatpush1.msra.mxu1 %v2711_v9 }
  0x63   : > { %672 = vmatprep.mubr.f32.mxu1 %v2548_v0  ;;  %2265 = vmatprep.subr.mxu0 %v2548_v0 }
  0x64   : > { %674 = vmatmul.mubr.f32.vlgmr.msra.gmra.mxu1 %v2718_v12  ;;  %2266 = vmatpush3.msra.mxu0 %v2773_v35 }
  0x65   : > { %2267 = vmatprep.mubr.msk.f32.mxu0 %vm2549_vm1, %v2548_v0  ;;  %2270 = vmatprep.subr.mxu1 %v2548_v0 }
  0x66   : > { %2268 = vmatmul.mubr.f32.vlgmr.msra.gmra.mxu0 %v262_v34  ;;  %2271 = vmatpush3.msra.mxu1 %v2820_v44 }
  0x67   : > { %2277 = vmatprep.subr.mxu0 %v2548_v0  ;;  %2272 = vmatprep.subr.mxu1 %v2548_v0 }
  0x68   : > { %2278 = vmatpush3.msra.mxu0 %v2779_v36  ;;  %2273 = vmatpush3.msra.mxu1 %v2829_v46 }
  0x69   : > { %2274 = vmatprep.mubr.msk.f32.mxu1 %vm2549_vm1, %v2548_v0  ;;  %2279 = vmatprep.subr.mxu0 %v2548_v0 }
  0x6a   : > { %2275 = vmatmul.mubr.f32.vlgmr.msra.gmra.mxu1 %v2718_v12  ;;  %2280 = vmatpush3.msra.mxu0 %v2786_v37 }
  0x6b   : > { %2281 = vmatprep.mubr.msk.f32.mxu0 %vm2549_vm1, %v2548_v0  ;;  %2284 = vmatprep.subr.mxu1 %v2548_v0 }
  0x6c   : > { %2282 = vmatmul.mubr.f32.vlgmr.msra.gmra.mxu0 %v2735_v17  ;;  %2285 = vmatpush3.msra.mxu1 %v2769_v33 }
  0x6d   : > { %2291 = vmatprep.subr.mxu0 %v2548_v0  ;;  %2286 = vmatprep.subr.mxu1 %v2548_v0 }
  0x6e   : > { %2292 = vmatpush3.msra.mxu0 %v2793_v38  ;;  %2287 = vmatpush3.msra.mxu1 %v2773_v35 }
  0x6f   : > { %2288 = vmatprep.mubr.msk.f32.mxu1 %vm2549_vm1, %v2548_v0  ;;  %2293 = vmatprep.subr.mxu0 %v2548_v0 }
  0x70   : > { %2289 = vmatmul.mubr.f32.vlgmr.msra.gmra.mxu1 %v2750_v22  ;;  %2294 = vmatpush3.msra.mxu0 %v2800_v39 }
  0x71   : > { %2295 = vmatprep.mubr.msk.f32.mxu0 %vm2549_vm1, %v2548_v0  ;;  %2298 = vmatprep.subr.mxu1 %v2548_v0 }
  0x72   : > { %2296 = vmatmul.mubr.f32.vlgmr.msra.gmra.mxu0 %v2718_v12  ;;  %2299 = vmatpush3.msra.mxu1 %v2769_v33 }
  0x73   : > { %1171 = vmatprep.subr.mxu0 %v2704_v4  ;;  %2300 = vmatprep.subr.mxu1 %v2548_v0 }
  0x74   : > { %1173 = vmatpush1.msra.mxu0 %v2706_v5  ;;  %2301 = vmatpush3.msra.mxu1 %v2773_v35 }
  0x75   : > { %2302 = vmatprep.mubr.msk.f32.mxu1 %vm2549_vm1, %v2548_v0  ;;  %1175 = vmatprep.subr.mxu0 %v2708_v6 }
  0x76   : > { %2303 = vmatmul.mubr.f32.vlgmr.msra.gmra.mxu1 %v2718_v12  ;;  %1177 = vmatpush1.msra.mxu0 %v2711_v9 }
  0x77   : > { %1210 = vmatprep.mubr.f32.mxu0 %v2548_v0  ;;  %1255 = vmatprep.subr.mxu1 %v2759_v27 }
  0x78   : > { %1216 = vmatmul.mubr.f32.vlgmr.msra.gmra.mxu0 %v1215_v50  ;;  %1261 = vmatpush1.msra.mxu1 %v2763_v29 }
  0x79   : > { %1344 = vmatprep.subr.mxu0 %v2716_v11  ;;  %1267 = vmatprep.subr.mxu1 %v2765_v31 }
  0x7a   : > { %1347 = vmatpush1.msra.mxu0 %v2721_v13  ;;  %1273 = vmatpush1.msra.mxu1 %v2767_v32 }
  0x7b   : > { %1306 = vmatprep.mubr.f32.mxu1 %v2548_v0  ;;  %1350 = vmatprep.subr.mxu0 %v2725_v14 }
  0x7c   : > { %1308 = vmatmul.mubr.f32.vlgmr.msra.gmra.mxu1 %v2822_v45  ;;  %1353 = vmatpush1.msra.mxu0 %v2728_v15 }
  0x7d   : > { %1386 = vmatprep.mubr.f32.mxu0 %v2548_v0  ;;  %1424 = vmatprep.subr.mxu1 %v2704_v4 }
  0x7e   : > { %1389 = vmatmul.mubr.f32.vlgmr.msra.gmra.mxu0 %v2837_v47  ;;  %1426 = vmatpush1.msra.mxu1 %v2706_v5 }
  0x7f   : > { %1504 = vmatprep.subr.mxu0 %v2732_v16  ;;  %1428 = vmatprep.subr.mxu1 %v2708_v6 }
  0x80   : > { %1508 = vmatpush1.msra.mxu0 %v2738_v18  ;;  %1430 = vmatpush1.msra.mxu1 %v2711_v9 }
  0x81   : > { %1463 = vmatprep.mubr.f32.mxu1 %v2548_v0  ;;  %1512 = vmatprep.subr.mxu0 %v2742_v19 }
  0x82   : > { %1467 = vmatmul.mubr.f32.vlgmr.msra.gmra.mxu1 %v2850_v48  ;;  %1516 = vmatpush1.msra.mxu0 %v2745_v20 }
  0x83   : > { %1549 = vmatprep.mubr.f32.mxu0 %v2548_v0  ;;  %1586 = vmatprep.subr.mxu1 %v2704_v4 }
  0x84   : > { %1551 = vmatmul.mubr.f32.vlgmr.msra.gmra.mxu0 %v2822_v45  ;;  %1588 = vmatpush1.msra.mxu1 %v2706_v5 }
  0x85   : > { %2305 = vmatprep.subr.mxu0 %v2548_v0  ;;  %1590 = vmatprep.subr.mxu1 %v2708_v6 }
  0x86   : > { %2306 = vmatpush3.msra.mxu0 %v2769_v33  ;;  %1592 = vmatpush1.msra.mxu1 %v2711_v9 }
  0x87   : > { %1625 = vmatprep.mubr.f32.mxu1 %v2548_v0  ;;  %2307 = vmatprep.subr.mxu0 %v2548_v0 }
  0x88   : > { %1627 = vmatmul.mubr.f32.vlgmr.msra.gmra.mxu1 %v2822_v45  ;;  %2308 = vmatpush3.msra.mxu0 %v2773_v35 }
  0x89   : > { %2309 = vmatprep.mubr.msk.f32.mxu0 %vm2549_vm1, %v2548_v0  ;;  %2312 = vmatprep.subr.mxu1 %v2548_v0 }
  0x8a   : > { %2310 = vmatmul.mubr.f32.vlgmr.msra.gmra.mxu0 %v1215_v50  ;;  %2313 = vmatpush3.msra.mxu1 %v2820_v44 }
  0x8b   : > { %2319 = vmatprep.subr.mxu0 %v2548_v0  ;;  %2314 = vmatprep.subr.mxu1 %v2548_v0 }
  0x8c   : > { %2320 = vmatpush3.msra.mxu0 %v2779_v36  ;;  %2315 = vmatpush3.msra.mxu1 %v2829_v46 }
  0x8d   : > { %2316 = vmatprep.mubr.msk.f32.mxu1 %vm2549_vm1, %v2548_v0  ;;  %2321 = vmatprep.subr.mxu0 %v2548_v0 }
  0x8e   : > { %2317 = vmatmul.mubr.f32.vlgmr.msra.gmra.mxu1 %v2822_v45  ;;  %2322 = vmatpush3.msra.mxu0 %v2786_v37 }
  0x8f   : > { %2323 = vmatprep.mubr.msk.f32.mxu0 %vm2549_vm1, %v2548_v0  ;;  %2326 = vmatprep.subr.mxu1 %v2548_v0 }
  0x90   : > { %2324 = vmatmul.mubr.f32.vlgmr.msra.gmra.mxu0 %v2837_v47  ;;  %2327 = vmatpush3.msra.mxu1 %v2769_v33 }
  0x91   : > { %2333 = vmatprep.subr.mxu0 %v2548_v0  ;;  %2328 = vmatprep.subr.mxu1 %v2548_v0 }
  0x92   : > { %2334 = vmatpush3.msra.mxu0 %v2793_v38  ;;  %2329 = vmatpush3.msra.mxu1 %v2773_v35 }
  0x93   : > { %2330 = vmatprep.mubr.msk.f32.mxu1 %vm2549_vm1, %v2548_v0  ;;  %2335 = vmatprep.subr.mxu0 %v2548_v0 }
  0x94   : > { %2331 = vmatmul.mubr.f32.vlgmr.msra.gmra.mxu1 %v2850_v48  ;;  %2336 = vmatpush3.msra.mxu0 %v2800_v39 }
  0x95   : > { %2337 = vmatprep.mubr.msk.f32.mxu0 %vm2549_vm1, %v2548_v0  ;;  %2340 = vmatprep.subr.mxu1 %v2548_v0 }
  0x96   : > { %2338 = vmatmul.mubr.f32.vlgmr.msra.gmra.mxu0 %v2822_v45  ;;  %2341 = vmatpush3.msra.mxu1 %v2769_v33 }
  0x97   : > { %2344 = vmatprep.mubr.msk.f32.mxu1 %vm2549_vm1, %v2548_v0  ;;  %2342 = vmatprep.subr.mxu1 %v2548_v0 }
  0x98   : > { %2343 = vmatpush3.msra.mxu1 %v2773_v35 }
  0x99   : > { %2345 = vmatmul.mubr.f32.vlgmr.msra.gmra.mxu1 %v2822_v45 }
 0x116   : > { %v264_v51 = vpop.f32.mrf.mxu0 }
 0x117   : > { %v356_v53 = vpop.f32.mrf.mxu1 }
 0x118   : > { %v266_v52 = vpop.f32.mrf.mxu0  ;;  %v357_v11 = vadd.f32 %v356_v53, %v264_v51 }
 0x119   : > { %v358_v55 = vpop.f32.mrf.mxu1 }
 0x11a   : > { %v437_v54 = vpop.f32.mrf.mxu0  ;;  %v359_v9 = vadd.f32 %v358_v55, %v266_v52 }
 0x11b   : > { %v438_v16 = vadd.f32 %v437_v54, %v357_v11 }
 0x11c   : > { %v439_v56 = vpop.f32.mrf.mxu0 }
 0x11d   : > { %v440_v14 = vadd.f32 %v439_v56, %v359_v9 }
 0x11e   : > { %v515_v57 = vpop.f32.mrf.mxu1 }
 0x11f   : > { %v516_v22 = vadd.f32 %v515_v57, %v438_v16 }
 0x120   : > { %v599_v58 = vpop.f32.mrf.mxu0  ;;  %v517_v59 = vpop.f32.mrf.mxu1 }
 0x121   : > { %v518_v19 = vadd.f32 %v517_v59, %v440_v14  ;;  %v600_v27 = vadd.f32 %v599_v58, %v516_v22 }
 0x122   : > { %v601_v60 = vpop.f32.mrf.mxu0 }
 0x123   : > { %v602_v25 = vadd.f32 %v601_v60, %v518_v19 }
 0x124   : > { %v675_v61 = vpop.f32.mrf.mxu1 }
 0x125   : > { %v676_v35 = vadd.f32 %v675_v61, %v600_v27 }
 0x126   : > { %v753_v62 = vpop.f32.mrf.mxu0  ;;  %v677_v63 = vpop.f32.mrf.mxu1 }
 0x127   : > { %v678_v32 = vadd.f32 %v677_v63, %v602_v25 }
 0x128   : > { %v2269_v1 = vpop.f32.mrf.mxu0 }
 0x129   : > { %2411 = vrcp.f32 %v678_v32 }
 0x12a   : > { %v834_v2 = vpop.f32.mrf.mxu1  ;;  %2413 = vrcp.f32 %v676_v35 }
 0x12b   : > { %v835_v17 = vadd.f32 %v834_v2, %v753_v62 }
 0x12c   : > { %v910_v0 = vpop.f32.mrf.mxu0  ;;  %v2276_v3 = vpop.f32.mrf.mxu1 }
 0x12d   : > { %v911_v23 = vadd.f32 %v910_v0, %v835_v17 }
 0x12e   : > { %v2283_v4 = vpop.f32.mrf.mxu0 }
 0x130   : > { %v985_v5 = vpop.f32.mrf.mxu1 }
 0x131   : > { %v986_v28 = vadd.f32 %v985_v5, %v911_v23 }
 0x132   : > { %v1062_v6 = vpop.f32.mrf.mxu0  ;;  %v2290_v7 = vpop.f32.mrf.mxu1 }
 0x133   : > { %v1063_v36 = vadd.f32 %v1062_v6, %v986_v28  ;;  %v2099_v7 = vmul.f32 %v678_v32, %v676_v35 }
 0x134   : > { %v2297_v8 = vpop.f32.mrf.mxu0 }
 0x136   : > { %v1135_v10 = vpop.f32.mrf.mxu1  ;;  %v2412_v58 = vpop.eup %2411 }
 0x137   : > { %v1136_v42 = vadd.f32 %v1135_v10, %v1063_v36  ;;  %v2414_v63 = vpop.eup %2413 }
 0x138   : > { %v1217_v12 = vpop.f32.mrf.mxu0  ;;  %v2304_v13 = vpop.f32.mrf.mxu1 }
 0x139   : > { %2415 = vrcp.f32 %v1136_v42  ;;  %v2104_v9 = vmul.f32 %v1136_v42, %v676_v35  ;;  %v2109_v10 = vmul.f32 %v1136_v42, %v678_v32 }
 0x13a   : > { %v1219_v15 = vpop.f32.mrf.mxu0 }
 0x13c   : > { %v1309_v18 = vpop.f32.mrf.mxu1 }
 0x13d   : > { %v1310_v33 = vadd.f32 %v1309_v18, %v1217_v12 }
 0x13e   : > { %v1390_v20 = vpop.f32.mrf.mxu0  ;;  %v1311_v21 = vpop.f32.mrf.mxu1 }
 0x13f   : > { %v1312_v29 = vadd.f32 %v1311_v21, %v1219_v15  ;;  %v1391_v39 = vadd.f32 %v1390_v20, %v1310_v33 }
 0x140   : > { %v1392_v24 = vpop.f32.mrf.mxu0 }
 0x141   : > { %v1393_v37 = vadd.f32 %v1392_v24, %v1312_v29 }
 0x142   : > { %v1468_v26 = vpop.f32.mrf.mxu1 }
 0x143   : > { %v1469_v45 = vadd.f32 %v1468_v26, %v1391_v39 }
 0x144   : > { %v1552_v30 = vpop.f32.mrf.mxu0  ;;  %v1470_v31 = vpop.f32.mrf.mxu1 }
 0x145   : > { %v1471_v43 = vadd.f32 %v1470_v31, %v1393_v37  ;;  %v1553_v51 = vadd.f32 %v1552_v30, %v1469_v45 }
 0x146   : > { %v1554_v34 = vpop.f32.mrf.mxu0  ;;  %v2416_v5 = vpop.eup %2415 }
 0x147   : > { %v1555_v47 = vadd.f32 %v1554_v34, %v1471_v43 }
 0x148   : > { %v1628_v38 = vpop.f32.mrf.mxu1 }
 0x149   : > { %v1629_v56 = vadd.f32 %v1628_v38, %v1553_v51 }
 0x14a   : > { %v1706_v40 = vpop.f32.mrf.mxu0  ;;  %v1630_v41 = vpop.f32.mrf.mxu1 }
 0x14b   : > { %v1631_v54 = vadd.f32 %v1630_v41, %v1555_v47  ;;  %v2093_v2 = vmul.f32 %v2414_v63, %v1629_v56 }
 0x14c   : > { %v2311_v44 = vpop.f32.mrf.mxu0 }
 0x14d   : > { %v2095_v61 = vmul.f32 %v2412_v58, %v1631_v54 }
 0x14e   : > { %v1787_v46 = vpop.f32.mrf.mxu1 }
 0x14f   : > { %v1788_v48 = vadd.f32 %v1787_v46, %v1706_v40  ;;  %v2098_v3 = vsub.f32 %v2093_v2, %v2095_v61 }
 0x150   : > { %v1863_v49 = vpop.f32.mrf.mxu0  ;;  %v2318_v50 = vpop.f32.mrf.mxu1 }
 0x151   : > { %v1864_v52 = vadd.f32 %v1863_v49, %v1788_v48  ;;  %v2100_v11 = vmul.f32 %v2099_v7, %v2098_v3 }
 0x152   : > { %v2325_v53 = vpop.f32.mrf.mxu0 }
 0x153   : > { %v2101_v16 = vmul.f32 %v2100_v11, %v2098_v3 }
 0x154   : > { %v1938_v55 = vpop.f32.mrf.mxu1 }
 0x155   : > { %v1939_v57 = vadd.f32 %v1938_v55, %v1864_v52 }
 0x156   : > { %v2015_v59 = vpop.f32.mrf.mxu0  ;;  %v2332_v60 = vpop.f32.mrf.mxu1 }
 0x157   : > { %v2016_v62 = vadd.f32 %v2015_v59, %v1939_v57 }
 0x158   : > { %v2339_v1 = vpop.f32.mrf.mxu0 }
 0x159   : > { %v2088_v0 = vpop.f32.mrf.mxu1 }
 0x15a   : > { %v2089_v4 = vadd.f32 %v2088_v0, %v2016_v62 }
 0x15b   : > { %v2346_v6 = vpop.f32.mrf.mxu1 }
 0x15c   : > { %v2097_v8 = vmul.f32 %v2416_v5, %v2089_v4 }
 0x15e   : > { %v2103_v12 = vsub.f32 %v2093_v2, %v2097_v8  ;;  %v2108_v13 = vsub.f32 %v2095_v61, %v2097_v8 }
 0x160   : > { %v2105_v14 = vmul.f32 %v2104_v9, %v2103_v12  ;;  %v2110_v15 = vmul.f32 %v2109_v10, %v2108_v13 }
 0x162   : > { %v2106_v17 = vmul.f32 %v2105_v14, %v2103_v12  ;;  %v2111_v19 = vmul.f32 %v2110_v15, %v2108_v13 }
 0x164   : > { %v2107_v18 = vadd.f32 %v2106_v17, %v2101_v16 }
 0x166   : > { %v2112_v20 = vadd.f32 %v2111_v19, %v2107_v18 }
 0x168   : > { %vm2113_vm2 = vcmp.ne.f32.partialorder %v2112_v20, %v2112_v20 }
 0x169   : > { %v2114_v21 = vsel %vm2113_vm2, 0.0, %v2112_v20 }
 0x16a   : > { %2115 = vst [vmem:[%s175_s5] sm:$0xff] %v2114_v21 }
 0x16b   : > { %2484 = shalt.err (!%p2481_p10)
}
 0x16c   : > { %s2485_s7 = scalar_lea.hbm %s2955_s30, 128  ;;  %s2489_s17 = scalar_lea.hbm %s2994_s2, 256 }
 0x16d   : > { %p2486_p5 = scmp.ne.s32.totalorder %s2955_s30, %s2485_s7  ;;  %p2490_p12 = scmp.lt.s32.totalorder %s2955_s30, %s2994_s2 }
 0x16e   : > { %p2491_p13 = scmp.lt.s32.totalorder %s2489_s17, %s2485_s7 }
 0x16f   : > { %p2487_p11 = pnand %p2486_p5, %p3010_p1 }
 0x170   : > { %p2492_p4 = por %p2491_p13, %p2490_p12 }
 0x171   : > { %p2488_p6 = pneg %p2487_p11 }
 0x173   : > { %p2493_p0 = pnand %p2492_p4, %p2488_p6 }
 0x175   : > { %2496 = shalt.err (!%p2493_p0)
}
 0x176   : > { %2353 = dma.vmem_to_hbm [thread:$0]  (%p3010_p1), %s2131_s16, 128, %s2955_s30, %s2117_s3  }
 0x177 PF: > { %s2142_s28 = sand.u32 1, %s2527_s9   ;;  %p3011_p2 = scmp.ne.s32.totalorder %s3002_s22, 0 }
 0x178   : > { %p3012_p3 = scmp.ge.s32.totalorder %s2539_s12, 2  ;;  %s2143_s29 = scalar_lea.sflag [#allocation4], %s2142_s28 }
 0x17a   : > { %p2364_p7 = pnand %p3012_p3, %p3011_p2 }
 0x17c   : > { %p2365_p8 = pneg %p2364_p7 }
 0x17e   : > { %2522 = dma.done.wait (%p2365_p8), %s2143_s29, 128  }
 0x17f   : > { %2524 = vsyncadd (%p2365_p8), %s2143_s29, 4294967168  ;;  %p16_p9 = scmp.ge.s32.totalorder %s2591_s15, 4   ;;  %s3013_s9 = smov %s2531_s10 }
 0x180   : > { %s3014_s10 = smov %s2535_s11  ;;  %s3015_s11 = smov %s2603_s18 }
 0x181   : > { %s3016_s12 = smov %s2591_s15  ;;  %18 = sbr.rel (!%p16_p9) target bundleno = 6 (0x6), region = 79 }
 0x186   :  { %2148 = vsyncpa [#allocation3], 1 }
 0x187   :  { %2150 = vsyncpa [#allocation3 + $0x1], 1 }
 0x188   :  { %2151 = vsyncpa [#allocation6], 1 }
 0x189   :  { %2153 = vsyncpa [#allocation6 + $0x1], 1 }
 0x18a   :  { %2154 = vsyncpa [#allocation4], 1 }
 0x18b   :  { %2156 = vsyncpa [#allocation4 + $0x1], 1 }

</bundles_post_ra>
